<compile_context>
chip_gen: v7x
topology: tpu7x:2x2x1
jax: 0.10.0
libtpu: 0.0.40
codegen_flags: <defaults>
</compile_context>

<pallas_src>
import functools

import numpy as np

import jax
import jax.numpy as jnp
from jax.experimental import pallas as pl
from jax.experimental.pallas import tpu as pltpu


_LANE = 128
_TARGET_BLOCK_BYTES = 4 << 20   # per input block; 2x(in)+2x(out) buffers ~ 16 MiB
_MAX_FOLDED_ROWS = 512          # bound on Bt*C in the folded path (keeps the
                                # one-hot regroup matrices tiny)


def _excite(y, w1_ref, b1_ref, w2_ref, b2_ref):
    """Linear -> ReLU -> Linear -> Sigmoid on the squeezed (Bt, C) tensor, f32."""
    h = jnp.dot(y, w1_ref[...], preferred_element_type=jnp.float32) + b1_ref[...]
    h = jnp.maximum(h, 0.0)
    s = jnp.dot(h, w2_ref[...], preferred_element_type=jnp.float32) + b2_ref[...]
    return jax.nn.sigmoid(s)


def _se_kernel_3d(x_ref, w1_ref, b1_ref, w2_ref, b2_ref, o_ref, *, inv_hw):
    # x_ref: (Bt, C, HW_pad), used when C % 8 == 0 (dense sublanes already).
    x = x_ref[...].astype(jnp.float32)
    y = jnp.sum(x, axis=-1) * inv_hw                       # squeeze: (Bt, C)
    s = _excite(y, w1_ref, b1_ref, w2_ref, b2_ref)         # excite:  (Bt, C)
    o_ref[...] = (x * s[:, :, None]).astype(o_ref.dtype)   # scale


def _se_kernel_folded(x_ref, w1_ref, b1_ref, w2_ref, b2_ref,
                      gather_ref, scatter_ref, chan_ref, o_ref, *, inv_hw):
    # x_ref: (Bt*C, HW_pad) -- batch folded into the sublane axis (C not mult of 8).
    # gather_ref: (Bt, Bt*C), scatter_ref: (Bt*C, Bt), chan_ref: (Bt*C, C) are tiny
    # one-hot constants that map rows (b*C + c) <-> (b, c) without big reshapes.
    x = x_ref[...].astype(jnp.float32)
    m = jnp.sum(x, axis=-1, keepdims=True) * inv_hw        # per-row mean: (Bt*C, 1)
    chan_sel = chan_ref[...]
    # y[b, c] = m[b*C + c]
    y = jnp.dot(gather_ref[...], m * chan_sel, preferred_element_type=jnp.float32)
    s = _excite(y, w1_ref, b1_ref, w2_ref, b2_ref)         # (Bt, C)
    # s_rows[i] = s[i // C, i % C]
    s_rows = jnp.sum(
        jnp.dot(scatter_ref[...], s, preferred_element_type=jnp.float32) * chan_sel,
        axis=-1, keepdims=True)                            # (Bt*C, 1)
    o_ref[...] = (x * s_rows).astype(o_ref.dtype)


def _pick_batch_tile(B, C, row_bytes, folded):
    """Largest batch tile Bt (divisor of B) under the VMEM block target."""
    cands = []
    for bt in range(1, B + 1):
        if B % bt:
            continue
        if folded:
            if bt * C > _MAX_FOLDED_ROWS:
                continue
            if (bt * C) % 8 != 0 and bt != B:   # full-dim blocks are always legal
                continue
        cands.append(bt)
    if not cands:
        return None
    under = [bt for bt in cands if bt * row_bytes <= _TARGET_BLOCK_BYTES]
    if under:
        multi = [bt for bt in under if B // bt >= 2]   # keep >=2 grid steps (v7x 2 TCs)
        return max(multi) if multi else max(under)
    return min(cands)


@jax.jit
def se_block(x, w1, b1, w2, b2):
    """x: (B, C, H, W); w1: (C, mid); b1: (1, mid); w2: (mid, C); b2: (1, C).

    Weights are pre-transposed to (in, out) layout (PyTorch Linear stores (out, in)).
    """
    B, C, H, W = x.shape
    mid = w1.shape[1]
    HW = H * W
    HW_pad = ((HW + _LANE - 1) // _LANE) * _LANE
    itemsize = x.dtype.itemsize
    row_bytes = C * HW_pad * itemsize            # bytes per batch element

    folded = (C % 8 != 0)
    bt = _pick_batch_tile(B, C, row_bytes, folded)
    if bt is None:                               # folded tiling infeasible -> 3D path
        folded = False
        bt = _pick_batch_tile(B, C, row_bytes, False)

    x_flat = x.reshape(B, C, HW)
    if HW_pad != HW:
        # zero-pad spatial axis up to a lane multiple; mean divides by the true HW
        x_flat = jnp.pad(x_flat, ((0, 0), (0, 0), (0, HW_pad - HW)))

    inv_hw = 1.0 / float(HW)
    block_bytes = bt * row_bytes
    weight_bytes = int((w1.size + b1.size + w2.size + b2.size) * w1.dtype.itemsize)
    vmem_limit = int(min(96 << 20,
                         max(16 << 20, 4 * block_bytes + 8 * weight_bytes + (2 << 20))))

    cost = pl.CostEstimate(
        flops=int(2 * B * C * HW + 4 * B * C * mid),
        transcendentals=int(B * C),
        bytes_accessed=int(2 * B * C * HW_pad * itemsize + 2 * weight_bytes),
    )
    compiler_params = pltpu.CompilerParams(
        dimension_semantics=("parallel",),       # batch-block grid; shards across TCs
        vmem_limit_bytes=vmem_limit,
    )
    weight_specs = [
        pl.BlockSpec((C, mid), lambda b: (0, 0)),
        pl.BlockSpec((1, mid), lambda b: (0, 0)),
        pl.BlockSpec((mid, C), lambda b: (0, 0)),
        pl.BlockSpec((1, C), lambda b: (0, 0)),
    ]

    if folded:
        btc = bt * C
        rows = np.arange(btc)
        gather = (rows[None, :] // C == np.arange(bt)[:, None]).astype(np.float32)  # (Bt, Bt*C)
        scatter = np.ascontiguousarray(gather.T)                                    # (Bt*C, Bt)
        chan = (rows[:, None] % C == np.arange(C)[None, :]).astype(np.float32)      # (Bt*C, C)

        x2d = x_flat.reshape(B * C, HW_pad)
        kernel = functools.partial(_se_kernel_folded, inv_hw=inv_hw)
        out2d = pl.pallas_call(
            kernel,
            out_shape=jax.ShapeDtypeStruct((B * C, HW_pad), x.dtype),
            grid_spec=pltpu.PrefetchScalarGridSpec(
                num_scalar_prefetch=0,
                grid=(B // bt,),
                in_specs=[pl.BlockSpec((btc, HW_pad), lambda b: (b, 0))] + weight_specs + [
                    pl.BlockSpec((bt, btc), lambda b: (0, 0)),
                    pl.BlockSpec((btc, bt), lambda b: (0, 0)),
                    pl.BlockSpec((btc, C), lambda b: (0, 0)),
                ],
                out_specs=pl.BlockSpec((btc, HW_pad), lambda b: (b, 0)),
            ),
            compiler_params=compiler_params,
            cost_estimate=cost,
        )(x2d, w1, b1, w2, b2,
          jnp.asarray(gather), jnp.asarray(scatter), jnp.asarray(chan))
        out_flat = out2d.reshape(B, C, HW_pad)
    else:
        kernel = functools.partial(_se_kernel_3d, inv_hw=inv_hw)
        out_flat = pl.pallas_call(
            kernel,
            out_shape=jax.ShapeDtypeStruct((B, C, HW_pad), x.dtype),
            grid_spec=pltpu.PrefetchScalarGridSpec(
                num_scalar_prefetch=0,
                grid=(B // bt,),
                in_specs=[pl.BlockSpec((bt, C, HW_pad), lambda b: (b, 0, 0))] + weight_specs,
                out_specs=pl.BlockSpec((bt, C, HW_pad), lambda b: (b, 0, 0)),
            ),
            compiler_params=compiler_params,
            cost_estimate=cost,
        )(x_flat, w1, b1, w2, b2)

    if HW_pad != HW:
        out_flat = out_flat[:, :, :HW]
    return out_flat.reshape(B, C, H, W)


def se_block_ref(x, w1, b1, w2, b2):
    """Pure-JAX reference mirroring the PyTorch forward (compute in f32)."""
    xf = x.astype(jnp.float32)
    y = jnp.mean(xf, axis=(2, 3))                      # (B, C)
    h = jnp.maximum(y @ w1 + b1, 0.0)                  # (B, mid)
    s = jax.nn.sigmoid(h @ w2 + b2)                    # (B, C)
    return (xf * s[:, :, None, None]).astype(x.dtype)


def _make_inputs(key, B, C, H, W, reduction, dtype):
    mid = int(C / reduction)
    kx, kw1, kb1, kw2, kb2 = jax.random.split(key, 5)
    x = jax.random.normal(kx, (B, C, H, W), dtype=jnp.float32).astype(dtype)
    w1 = jax.random.normal(kw1, (C, mid), dtype=jnp.float32) * 0.1
    b1 = jax.random.normal(kb1, (1, mid), dtype=jnp.float32) * 0.1
    w2 = jax.random.normal(kw2, (mid, C), dtype=jnp.float32) * 0.1
    b2 = jax.random.normal(kb2, (1, C), dtype=jnp.float32) * 0.1
    return x, w1, b1, w2, b2


if __name__ == "__main__":
    k1, k2 = jax.random.split(jax.random.PRNGKey(0))

    # Case 1: module-consistent small shapes (B=2, C=4, 16x16, reduction=2).
    # C=4 is not a multiple of 8 -> exercises the folded (sublane-dense) path.
    x, w1, b1, w2, b2 = _make_inputs(k1, 2, 4, 16, 16, 2, jnp.float32)
    out = se_block(x, w1, b1, w2, b2)
    jax.block_until_ready(out)
    ref = se_block_ref(x, w1, b1, w2, b2)
    assert out.shape == x.shape
    assert jnp.allclose(out, ref, atol=1e-5, rtol=1e-5), "f32 kernel mismatch vs reference"

    # Case 2: C=8 (3-D blocked path), 7x7 spatial (HW=49 -> padded to 128), bf16 I/O.
    xb, w1b, b1b, w2b, b2b = _make_inputs(k2, 2, 8, 7, 7, 2, jnp.bfloat16)
    outb = se_block(xb, w1b, b1b, w2b, b2b)
    jax.block_until_ready(outb)
    refb = se_block_ref(xb, w1b, b1b, w2b, b2b)
    assert outb.shape == xb.shape and outb.dtype == jnp.bfloat16
    assert jnp.allclose(outb.astype(jnp.float32), refb.astype(jnp.float32),
                        atol=2e-2, rtol=2e-2), "bf16 kernel mismatch vs reference"

    print("KERNEL_OK")
</pallas_src>

<mosaic_0001>
module attributes {stable_mosaic.version = 11 : i64} {
  func.func @_se_kernel_folded(%arg0: i32, %arg1: memref<8x256xf32, #tpu.memory_space<vmem>>, %arg2: memref<4x2xf32, #tpu.memory_space<vmem>>, %arg3: memref<1x2xf32, #tpu.memory_space<vmem>>, %arg4: memref<2x4xf32, #tpu.memory_space<vmem>>, %arg5: memref<1x4xf32, #tpu.memory_space<vmem>>, %arg6: memref<2x8xf32, #tpu.memory_space<vmem>>, %arg7: memref<8x2xf32, #tpu.memory_space<vmem>>, %arg8: memref<8x4xf32, #tpu.memory_space<vmem>>, %arg9: memref<8x256xf32, #tpu.memory_space<vmem>>) attributes {dimension_semantics = [#tpu.dimension_semantics<parallel>], iteration_bounds = array<i64: 1>, scalar_prefetch = 0 : i64, scratch_operands = 0 : i64, tpu.core_type = #tpu.core_type<tc>, window_params = [{transform_indices = @transform_0, window_bounds = array<i64: 8, 256>}, {pipeline_mode = #tpu.pipeline_mode<synchronous>, transform_indices = @transform_1, window_bounds = array<i64: 4, 2>}, {pipeline_mode = #tpu.pipeline_mode<synchronous>, transform_indices = @transform_2, window_bounds = array<i64: 1, 2>}, {pipeline_mode = #tpu.pipeline_mode<synchronous>, transform_indices = @transform_3, window_bounds = array<i64: 2, 4>}, {pipeline_mode = #tpu.pipeline_mode<synchronous>, transform_indices = @transform_4, window_bounds = array<i64: 1, 4>}, {pipeline_mode = #tpu.pipeline_mode<synchronous>, transform_indices = @transform_5, window_bounds = array<i64: 2, 8>}, {pipeline_mode = #tpu.pipeline_mode<synchronous>, transform_indices = @transform_6, window_bounds = array<i64: 8, 2>}, {pipeline_mode = #tpu.pipeline_mode<synchronous>, transform_indices = @transform_7, window_bounds = array<i64: 8, 4>}, {transform_indices = @transform_8, window_bounds = array<i64: 8, 256>}]} {
    %c0 = arith.constant 0 : index
    %c0_0 = arith.constant 0 : index
    %0 = vector.load %arg1[%c0, %c0_0] : memref<8x256xf32, #tpu.memory_space<vmem>>, vector<8x256xf32>
    %cst = arith.constant dense<0.000000e+00> : vector<8xf32>
    %1 = vector.multi_reduction <add>, %0, %cst [1] : vector<8x256xf32> to vector<8xf32>
    %2 = vector.shape_cast %1 : vector<8xf32> to vector<8x1xf32>
    %cst_1 = arith.constant 3.906250e-03 : f32
    %3 = vector.broadcast %cst_1 : f32 to vector<8x1xf32>
    %4 = arith.mulf %2, %3 : vector<8x1xf32>
    %c0_2 = arith.constant 0 : index
    %c0_3 = arith.constant 0 : index
    %5 = vector.load %arg8[%c0_2, %c0_3] : memref<8x4xf32, #tpu.memory_space<vmem>>, vector<8x4xf32>
    %c0_4 = arith.constant 0 : index
    %c0_5 = arith.constant 0 : index
    %6 = vector.load %arg6[%c0_4, %c0_5] : memref<2x8xf32, #tpu.memory_space<vmem>>, vector<2x8xf32>
    %7 = vector.broadcast %4 : vector<8x1xf32> to vector<8x4xf32>
    %8 = arith.mulf %7, %5 : vector<8x4xf32>
    %cst_6 = arith.constant dense<0.000000e+00> : vector<2x4xf32>
    %9 = tpu.matmul %6, %8, %cst_6 {dimension_numbers = #tpu.dot_dimension_numbers<[1], [0], [0], [1], [0, 0, 1, 1], [], []>} : vector<2x8xf32>, vector<8x4xf32>, vector<2x4xf32> -> vector<2x4xf32>
    %c0_7 = arith.constant 0 : index
    %c0_8 = arith.constant 0 : index
    %10 = vector.load %arg2[%c0_7, %c0_8] : memref<4x2xf32, #tpu.memory_space<vmem>>, vector<4x2xf32>
    %cst_9 = arith.constant dense<0.000000e+00> : vector<2x2xf32>
    %11 = tpu.matmul %9, %10, %cst_9 {dimension_numbers = #tpu.dot_dimension_numbers<[1], [0], [0], [1], [0, 0, 1, 1], [], []>} : vector<2x4xf32>, vector<4x2xf32>, vector<2x2xf32> -> vector<2x2xf32>
    %c0_10 = arith.constant 0 : index
    %c0_11 = arith.constant 0 : index
    %12 = vector.load %arg3[%c0_10, %c0_11] : memref<1x2xf32, #tpu.memory_space<vmem>>, vector<1x2xf32>
    %13 = vector.broadcast %12 : vector<1x2xf32> to vector<2x2xf32>
    %14 = arith.addf %11, %13 : vector<2x2xf32>
    %cst_12 = arith.constant 0.000000e+00 : f32
    %15 = vector.broadcast %cst_12 : f32 to vector<2x2xf32>
    %16 = arith.maximumf %14, %15 : vector<2x2xf32>
    %c0_13 = arith.constant 0 : index
    %c0_14 = arith.constant 0 : index
    %17 = vector.load %arg4[%c0_13, %c0_14] : memref<2x4xf32, #tpu.memory_space<vmem>>, vector<2x4xf32>
    %cst_15 = arith.constant dense<0.000000e+00> : vector<2x4xf32>
    %18 = tpu.matmul %16, %17, %cst_15 {dimension_numbers = #tpu.dot_dimension_numbers<[1], [0], [0], [1], [0, 0, 1, 1], [], []>} : vector<2x2xf32>, vector<2x4xf32>, vector<2x4xf32> -> vector<2x4xf32>
    %c0_16 = arith.constant 0 : index
    %c0_17 = arith.constant 0 : index
    %19 = vector.load %arg5[%c0_16, %c0_17] : memref<1x4xf32, #tpu.memory_space<vmem>>, vector<1x4xf32>
    %20 = vector.broadcast %19 : vector<1x4xf32> to vector<2x4xf32>
    %21 = arith.addf %18, %20 : vector<2x4xf32>
    %22 = arith.negf %21 : vector<2x4xf32>
    %23 = math.exp %22 : vector<2x4xf32>
    %cst_18 = arith.constant 1.000000e+00 : f32
    %24 = vector.broadcast %cst_18 : f32 to vector<2x4xf32>
    %25 = arith.addf %24, %23 : vector<2x4xf32>
    %26 = arith.divf %24, %25 : vector<2x4xf32>
    %c0_19 = arith.constant 0 : index
    %c0_20 = arith.constant 0 : index
    %27 = vector.load %arg7[%c0_19, %c0_20] : memref<8x2xf32, #tpu.memory_space<vmem>>, vector<8x2xf32>
    %cst_21 = arith.constant dense<0.000000e+00> : vector<8x4xf32>
    %28 = tpu.matmul %27, %26, %cst_21 {dimension_numbers = #tpu.dot_dimension_numbers<[1], [0], [0], [1], [0, 0, 1, 1], [], []>} : vector<8x2xf32>, vector<2x4xf32>, vector<8x4xf32> -> vector<8x4xf32>
    %29 = arith.mulf %28, %5 : vector<8x4xf32>
    %cst_22 = arith.constant dense<0.000000e+00> : vector<8xf32>
    %30 = vector.multi_reduction <add>, %29, %cst_22 [1] : vector<8x4xf32> to vector<8xf32>
    %31 = vector.shape_cast %30 : vector<8xf32> to vector<8x1xf32>
    %32 = vector.broadcast %31 : vector<8x1xf32> to vector<8x256xf32>
    %33 = arith.mulf %0, %32 : vector<8x256xf32>
    %c0_23 = arith.constant 0 : index
    %c0_24 = arith.constant 0 : index
    %34 = vector.load %arg9[%c0_23, %c0_24] : memref<8x256xf32, #tpu.memory_space<vmem>>, vector<8x256xf32>
    tpu.vector_store %arg9[%c0_23, %c0_24], %33 {strides = array<i32>} : memref<8x256xf32, #tpu.memory_space<vmem>>, vector<8x256xf32>,
    return
  }
  func.func @transform_0(%arg0: i32) -> (i32, i32) {
    %c0_i32 = arith.constant 0 : i32
    %c0_i32_0 = arith.constant 0 : i32
    return %arg0, %c0_i32 : i32, i32
  }
  func.func @transform_1(%arg0: i32) -> (i32, i32) {
    %c0_i32 = arith.constant 0 : i32
    %c0_i32_0 = arith.constant 0 : i32
    %c0_i32_1 = arith.constant 0 : i32
    return %c0_i32, %c0_i32_0 : i32, i32
  }
  func.func @transform_2(%arg0: i32) -> (i32, i32) {
    %c0_i32 = arith.constant 0 : i32
    %c0_i32_0 = arith.constant 0 : i32
    %c0_i32_1 = arith.constant 0 : i32
    return %c0_i32, %c0_i32_0 : i32, i32
  }
  func.func @transform_3(%arg0: i32) -> (i32, i32) {
    %c0_i32 = arith.constant 0 : i32
    %c0_i32_0 = arith.constant 0 : i32
    %c0_i32_1 = arith.constant 0 : i32
    return %c0_i32, %c0_i32_0 : i32, i32
  }
  func.func @transform_4(%arg0: i32) -> (i32, i32) {
    %c0_i32 = arith.constant 0 : i32
    %c0_i32_0 = arith.constant 0 : i32
    %c0_i32_1 = arith.constant 0 : i32
    return %c0_i32, %c0_i32_0 : i32, i32
  }
  func.func @transform_5(%arg0: i32) -> (i32, i32) {
    %c0_i32 = arith.constant 0 : i32
    %c0_i32_0 = arith.constant 0 : i32
    %c0_i32_1 = arith.constant 0 : i32
    return %c0_i32, %c0_i32_0 : i32, i32
  }
  func.func @transform_6(%arg0: i32) -> (i32, i32) {
    %c0_i32 = arith.constant 0 : i32
    %c0_i32_0 = arith.constant 0 : i32
    %c0_i32_1 = arith.constant 0 : i32
    return %c0_i32, %c0_i32_0 : i32, i32
  }
  func.func @transform_7(%arg0: i32) -> (i32, i32) {
    %c0_i32 = arith.constant 0 : i32
    %c0_i32_0 = arith.constant 0 : i32
    %c0_i32_1 = arith.constant 0 : i32
    return %c0_i32, %c0_i32_0 : i32, i32
  }
  func.func @transform_8(%arg0: i32) -> (i32, i32) {
    %c0_i32 = arith.constant 0 : i32
    %c0_i32_0 = arith.constant 0 : i32
    return %arg0, %c0_i32 : i32, i32
  }
}

</mosaic_0001>

<bundles_post_ra>
// kernel: se_block.1
= control target key start
LH: loop header
LB: loop body
LE: loop exit
PB: predicated region body
PF: predicated region fallthrough
CT: control target
= control target key end

     0   :  { %v424_v3 = vmov 0.0   ;;  %vm425_vm0 = vmmov 0   ;;  %vm38_vm1 = vcmask 64512   ;;  %vm124_vm2 = vcmask 1043456   ;;  %s522_s0 = inlined_call_operand.vmem [shape: f32[8,256], index: 0, kind: input, shape index: {}]   ;;  %s523_s7 = inlined_call_operand.vmem [shape: f32[8,4], index: 7, kind: input, shape index: {}]   ;;  %s524_s5 = inlined_call_operand.vmem [shape: f32[2,8], index: 5, kind: input, shape index: {}]   ;;  %s525_s1 = inlined_call_operand.vmem [shape: f32[4,2], index: 1, kind: input, shape index: {}]   ;;  %s526_s3 = inlined_call_operand.vmem [shape: f32[2,4], index: 3, kind: input, shape index: {}]   ;;  %s527_s2 = inlined_call_operand.vmem [shape: f32[1,2], index: 2, kind: input, shape index: {}]   ;;  %s528_s4 = inlined_call_operand.vmem [shape: f32[1,4], index: 4, kind: input, shape index: {}]   ;;  %s529_s6 = inlined_call_operand.vmem [shape: f32[8,2], index: 6, kind: input, shape index: {}]   ;;  %s530_s8 = inlined_call_operand.vmem [shape: f32[8,256], index: 8, kind: output, shape index: {}]  }
   0x1   :  { %v474_v0 = vld [vmem:[%s522_s0] sm:$0xff]  ;;  %v479_v1 = vld [vmem:[%s522_s0 + $0x8] sm:$0xff]  ;;  %398 = vmatprep.subr.mxu0 %v424_v3  ;;  %403 = vmatprep.subr.mxu1 %v424_v3  ;;  %vm120_vm3 = vcmask 31744   ;;  %vm211_vm4 = vcmask 1041408   ;;  %vm207_vm5 = vcmask 15360  }
   0x2   :  { %v31_v2 = vadd.f32 %v479_v1, %v474_v0  ;;  %400 = vmatprep.mubr.msk.f32.mxu0 %vm425_vm0, %v424_v3  ;;  %405 = vmatprep.mubr.msk.f32.mxu1 %vm425_vm0, %v424_v3  ;;  %v35_v5 = vld [vmem:[%s523_s7] sm:$0xff] }
   0x3   :  { %v36_v8 = vld [vmem:[%s524_s5] sm:$0x3] }
   0x4   :  { %32 = vadd.xlane.f32.xlu0 %v31_v2  ;;  %v112_v9 = vld [vmem:[%s525_s1] sm:$0xf] }
   0x5   :  { %404 = vmatpush3.msk.msra.mxu1 %vm124_vm2, %v112_v9  ;;  %v199_v12 = vld [vmem:[%s526_s3] sm:$0x3] }
   0x6   :  { %413 = vmatprep.subr.mxu1 %v424_v3  ;;  %v381_v13 = vld [vmem:[%s527_s2] ss:$0 sm:$0xff] }
   0x7   :  { %v384_v18 = vld [vmem:[%s528_s4] ss:$0 sm:$0xff] }
   0x8   :  { %v291_v25 = vld [vmem:[%s529_s6] sm:$0xff] }
  0x91   :  { %v33_v4 = vpop.xlane.xlu0 %32 }
  0x92   :  { %v34_v6 = vmul.f32 0.00390625, %v33_v4 }
  0x94   :  { %v37_v7 = vmul.f32 %v35_v5, %v34_v6 }
  0x96   :  { %399 = vmatpush3.msra.mxu0 %v37_v7 }
  0x97   :  { %401 = vmatmul.mubr.msk.f32.vlgmr.msra.gmra.mrb[0].mxu0 %vm38_vm1, %v36_v8  ;;  %408 = vmatprep.subr.mxu0 %v424_v3 }
  0x98   :  { %410 = vmatprep.mubr.msk.f32.mxu0 %vm425_vm0, %v424_v3  ;;  %409 = vmatpush3.msk.msra.mxu0 %vm211_vm4, %v199_v12 }
 0x16a   :  { %v108_v10 = vpop.f32.mrb[0].mxu0 }
 0x16b   :  { %v402_v11 = vpop.f32.mrb[1].mxu0  ;;  %406 = vmatmul.mubr.msk.f32.vlgmr.msra.gmra.mrb[0].mxu1 %vm120_vm3, %v108_v10 }
 0x16c   :  { %415 = vmatprep.mubr.msk.f32.mxu1 %vm425_vm0, %v424_v3 }
 0x23e   :  { %v194_v14 = vpop.f32.mrb[0].mxu1 }
 0x23f   :  { %v195_v15 = vadd.f32 %v381_v13, %v194_v14  ;;  %v407_v16 = vpop.f32.mrb[1].mxu1 }
 0x241   :  { %v198_v17 = vmax.f32 %v195_v15, 0.0 }
 0x243   :  { %411 = vmatmul.mubr.msk.f32.vlgmr.msra.gmra.mrb[2].mxu0 %vm207_vm5, %v198_v17 }
 0x316   :  { %v281_v19 = vpop.f32.mrb[2].mxu0 }
 0x317   :  { %v282_v20 = vadd.f32 %v384_v18, %v281_v19  ;;  %v412_v21 = vpop.f32.mrb[3].mxu0 }
 0x319   :  { %v387_v22 = vmul.f32 -1.442695, %v282_v20 }
 0x31b   :  { %420 = vpow2.f32 %v387_v22 }
 0x325   :  { %v421_v23 = vpop.eup %420 }
 0x326   :  { %v288_v24 = vadd.f32 1.0, %v421_v23 }
 0x328   :  { %422 = vrcp.f32 %v288_v24 }
 0x332   :  { %v423_v26 = vpop.eup %422 }
 0x333   :  { %414 = vmatpush3.msk.msra.mxu1 %vm211_vm4, %v423_v26 }
 0x334   :  { %416 = vmatmul.mubr.msk.f32.vlgmr.msra.gmra.mrb[2].mxu1 %vm207_vm5, %v291_v25 }
 0x407   :  { %v364_v27 = vpop.f32.mrb[2].mxu1 }
 0x408   :  { %v368_v28 = vmul.f32 %v364_v27, %v35_v5  ;;  %v417_v29 = vpop.f32.mrb[3].mxu1 }
 0x40a   :  { %v369_v30 = vsel %vm120_vm3, %v368_v28, 0.0 }
 0x40b   :  { %370 = vadd.xlane.f32.xlu0 %v369_v30 }
 0x498   :  { %v371_v31 = vpop.xlane.xlu0 %370 }
 0x499   :  { %v372_v32 = vmul.f32 %v371_v31, %v474_v0  ;;  %v373_v33 = vmul.f32 %v371_v31, %v479_v1 }
 0x49b   :  { %374 = vst [vmem:[%s530_s8] sm:$0xff] %v372_v32  ;;  %375 = vst [vmem:[%s530_s8 + $0x8] sm:$0xff] %v373_v33 }

</bundles_post_ra>
